<compile_context>
chip_gen: v7x
topology: tpu7x:2x2x1
jax: 0.10.0
libtpu: 0.0.40
codegen_flags: <defaults>
</compile_context>

<pallas_src>
import functools

import jax
import jax.numpy as jnp
from jax.experimental import pallas as pl
from jax.experimental.pallas import tpu as pltpu

ALPHA = 0.25
GAMMA = 2.0
MAX_TILE_ROWS = 2048  # 2048 rows x 128 lanes x f32 x 2 channels = 2 MiB / input tile


def _focal_loss_kernel(x_ref, t_ref, num_ref, den_ref, acc_n_ref, acc_d_ref,
                       *, alpha, gamma, rows, tile_rows):
    # x_ref:   (2, TR, 128) logits tile (both channels of one sample)
    # t_ref:   (1, TR, 128) int8 target tile
    # num/den: (1, 1, 1)    per-sample weighted-sum outputs
    # acc_*:   (TR, 128)    f32 running partial sums (VMEM scratch)
    j = pl.program_id(1)

    @pl.when(j == 0)
    def _():
        acc_n_ref[...] = jnp.zeros_like(acc_n_ref)
        acc_d_ref[...] = jnp.zeros_like(acc_d_ref)

    x0 = x_ref[0].astype(jnp.float32)                     # (TR, 128)
    x1 = x_ref[1].astype(jnp.float32)
    tf = t_ref[0].astype(jnp.int32).astype(jnp.float32)   # targets in {0., 1.}

    d = x1 - x0
    v = (1.0 - 2.0 * tf) * d            # p_t = sigmoid(-v)
    w = alpha + (1.0 - 2.0 * alpha) * tf                  # class weight w[t]

    if rows % tile_rows != 0:           # mask the ragged last pixel tile
        row_ids = jax.lax.broadcasted_iota(jnp.int32, (tile_rows, 128), 0)
        valid = (j * tile_rows + row_ids) < rows
        v = jnp.where(valid, v, 0.0)
        w = jnp.where(valid, w, 0.0)

    # Numerically stable softplus / sigmoid sharing a single exp (2 EUP ops/px).
    e = jnp.exp(-jnp.abs(v))                              # in (0, 1]
    softplus_v = jnp.maximum(v, 0.0) + jnp.log(1.0 + e)   # = -log p_t
    sig = jnp.where(v >= 0.0, 1.0, e) / (1.0 + e)         # = 1 - p_t

    if gamma == 2.0:
        focal = sig * sig                                 # (1 - p_t)**2, no pow
    elif float(gamma).is_integer() and gamma >= 0:
        focal = jnp.ones_like(sig)
        for _ in range(int(gamma)):
            focal = focal * sig
    else:
        focal = sig ** gamma                              # general fallback

    acc_n_ref[...] += w * focal * softplus_v              # w[t] * (-logits[t])
    acc_d_ref[...] += w

    @pl.when(j == pl.num_programs(1) - 1)
    def _():
        num_ref[...] = jnp.sum(acc_n_ref[...]).reshape(1, 1, 1)
        den_ref[...] = jnp.sum(acc_d_ref[...]).reshape(1, 1, 1)


def focal_loss(x_nchw, target_nhw, *, alpha=ALPHA, gamma=GAMMA):
    """x_nchw: (N, 2, H, W) float, target_nhw: (N, H, W) int -> scalar loss.

    Pass targets as int8 to avoid an extra HBM cast pass in the wrapper.
    """
    N, C, H, W = x_nchw.shape
    assert C == 2, "FocalLoss weight has 2 entries -> binary (C == 2) problem"
    P = H * W
    # TODO(synk): spatial sizes with H*W % 128 != 0 would additionally need lane masking.
    assert P % 128 == 0, "H*W must be a multiple of 128"
    rows = P // 128
    tile_rows = rows if rows <= MAX_TILE_ROWS else MAX_TILE_ROWS
    num_tiles = pl.cdiv(rows, tile_rows)

    # Free, contiguous reshapes (no transpose / no extra HBM pass over x):
    # channels of sample n are rows 2n / 2n+1 of a dense (rows, 128) layout.
    x_r = x_nchw.reshape(N * C, rows, 128)
    t_r = target_nhw.reshape(N, rows, 128)
    if t_r.dtype != jnp.int8:
        t_r = t_r.astype(jnp.int8)

    kernel = functools.partial(_focal_loss_kernel, alpha=float(alpha),
                               gamma=float(gamma), rows=rows, tile_rows=tile_rows)

    num, den = pl.pallas_call(
        kernel,
        out_shape=(
            jax.ShapeDtypeStruct((N, 1, 1), jnp.float32),
            jax.ShapeDtypeStruct((N, 1, 1), jnp.float32),
        ),
        grid_spec=pltpu.PrefetchScalarGridSpec(
            num_scalar_prefetch=0,
            grid=(N, num_tiles),
            in_specs=[
                pl.BlockSpec((2, tile_rows, 128), lambda n, j: (n, j, 0)),
                pl.BlockSpec((1, tile_rows, 128), lambda n, j: (n, j, 0)),
            ],
            out_specs=[
                pl.BlockSpec((1, 1, 1), lambda n, j: (n, 0, 0)),
                pl.BlockSpec((1, 1, 1), lambda n, j: (n, 0, 0)),
            ],
            scratch_shapes=[
                pltpu.VMEM((tile_rows, 128), jnp.float32),
                pltpu.VMEM((tile_rows, 128), jnp.float32),
            ],
        ),
        compiler_params=pltpu.CompilerParams(
            # sample axis shards across TensorCores (v7x megacore);
            # pixel-tile axis is the in-core reduction.
            dimension_semantics=("parallel", "arbitrary"),
        ),
    )(x_r, t_r)

    return jnp.sum(num) / jnp.sum(den)


def focal_loss_ref(x_nchw, target_nhw, *, alpha=ALPHA, gamma=GAMMA):
    """Pure-JAX reference mirroring the PyTorch module."""
    p = jax.nn.softmax(x_nchw, axis=1)
    logits = (1.0 - p) ** gamma * jnp.log(p)                       # (N, C, H, W)
    t = target_nhw.astype(jnp.int32)                               # (N, H, W)
    picked = jnp.take_along_axis(logits, t[:, None], axis=1)[:, 0]  # (N, H, W)
    w = jnp.where(t == 0, alpha, 1.0 - alpha)
    return jnp.sum(w * (-picked)) / jnp.sum(w)


if __name__ == "__main__":
    key = jax.random.PRNGKey(0)
    kx, kt = jax.random.split(key)

    N, C, H, W = 2, 2, 32, 32
    x = jax.random.normal(kx, (N, C, H, W), dtype=jnp.float32)
    target = jax.random.randint(kt, (N, H, W), 0, C, dtype=jnp.int32)

    loss = jax.block_until_ready(focal_loss(x, target))
    ref = jax.block_until_ready(focal_loss_ref(x, target))

    assert jnp.isfinite(loss), "non-finite loss"
    assert jnp.allclose(loss, ref, rtol=1e-4, atol=1e-6), (loss, ref)
    print("KERNEL_OK")
</pallas_src>

<mosaic_0001>
module attributes {stable_mosaic.version = 11 : i64} {
  func.func @_focal_loss_kernel(%arg0: i32, %arg1: i32, %arg2: memref<2x8x128xf32, #tpu.memory_space<vmem>>, %arg3: memref<1x8x128xi8, #tpu.memory_space<vmem>>, %arg4: memref<1x1x1xf32, #tpu.memory_space<vmem>>, %arg5: memref<1x1x1xf32, #tpu.memory_space<vmem>>, %arg6: memref<8x128xf32, #tpu.memory_space<vmem>>, %arg7: memref<8x128xf32, #tpu.memory_space<vmem>>) attributes {dimension_semantics = [#tpu.dimension_semantics<parallel>, #tpu.dimension_semantics<arbitrary>], iteration_bounds = array<i64: 2, 1>, scalar_prefetch = 0 : i64, scratch_operands = 2 : i64, tpu.core_type = #tpu.core_type<tc>, window_params = [{transform_indices = @transform_0, window_bounds = array<i64: 2, 8, 128>}, {transform_indices = @transform_1, window_bounds = array<i64: 1, 8, 128>}, {transform_indices = @transform_2, window_bounds = array<i64: 1, 1, 1>}, {transform_indices = @transform_3, window_bounds = array<i64: 1, 1, 1>}]} {
    %c0_i32 = arith.constant 0 : i32
    %0 = arith.cmpi eq, %arg1, %c0_i32 : i32
    %1 = arith.extui %0 : i1 to i32
    %c0_i32_0 = arith.constant 0 : i32
    %2 = arith.cmpi ne, %1, %c0_i32_0 : i32
    scf.if %2 {
      %cst_27 = arith.constant 0.000000e+00 : f32
      %50 = vector.broadcast %cst_27 : f32 to vector<8x128xf32>
      %c0_28 = arith.constant 0 : index
      %c0_29 = arith.constant 0 : index
      %51 = vector.load %arg6[%c0_28, %c0_29] : memref<8x128xf32, #tpu.memory_space<vmem>>, vector<8x128xf32>
      tpu.vector_store %arg6[%c0_28, %c0_29], %50 {strides = array<i32>} : memref<8x128xf32, #tpu.memory_space<vmem>>, vector<8x128xf32>,
      %cst_30 = arith.constant 0.000000e+00 : f32
      %52 = vector.broadcast %cst_30 : f32 to vector<8x128xf32>
      %c0_31 = arith.constant 0 : index
      %c0_32 = arith.constant 0 : index
      %53 = vector.load %arg7[%c0_31, %c0_32] : memref<8x128xf32, #tpu.memory_space<vmem>>, vector<8x128xf32>
      tpu.vector_store %arg7[%c0_31, %c0_32], %52 {strides = array<i32>} : memref<8x128xf32, #tpu.memory_space<vmem>>, vector<8x128xf32>,
    } else {
    }
    %c0 = arith.constant 0 : index
    %c0_1 = arith.constant 0 : index
    %c0_2 = arith.constant 0 : index
    %3 = vector.load %arg2[%c0, %c0_1, %c0_2] : memref<2x8x128xf32, #tpu.memory_space<vmem>>, vector<1x8x128xf32>
    %4 = vector.shape_cast %3 : vector<1x8x128xf32> to vector<8x128xf32>
    %c1 = arith.constant 1 : index
    %c0_3 = arith.constant 0 : index
    %c0_4 = arith.constant 0 : index
    %5 = vector.load %arg2[%c1, %c0_3, %c0_4] : memref<2x8x128xf32, #tpu.memory_space<vmem>>, vector<1x8x128xf32>
    %6 = vector.shape_cast %5 : vector<1x8x128xf32> to vector<8x128xf32>
    %c0_5 = arith.constant 0 : index
    %c0_6 = arith.constant 0 : index
    %c0_7 = arith.constant 0 : index
    %7 = vector.load %arg3[%c0_5, %c0_6, %c0_7] : memref<1x8x128xi8, #tpu.memory_space<vmem>>, vector<1x8x128xi8>
    %8 = vector.shape_cast %7 : vector<1x8x128xi8> to vector<8x128xi8>
    %9 = arith.extsi %8 : vector<8x128xi8> to vector<8x128xi32>
    %10 = arith.sitofp %9 : vector<8x128xi32> to vector<8x128xf32>
    %11 = arith.subf %6, %4 : vector<8x128xf32>
    %cst = arith.constant 2.000000e+00 : f32
    %12 = vector.broadcast %cst : f32 to vector<8x128xf32>
    %13 = arith.mulf %12, %10 : vector<8x128xf32>
    %cst_8 = arith.constant 1.000000e+00 : f32
    %14 = vector.broadcast %cst_8 : f32 to vector<8x128xf32>
    %15 = arith.subf %14, %13 : vector<8x128xf32>
    %16 = arith.mulf %15, %11 : vector<8x128xf32>
    %cst_9 = arith.constant 5.000000e-01 : f32
    %17 = vector.broadcast %cst_9 : f32 to vector<8x128xf32>
    %18 = arith.mulf %17, %10 : vector<8x128xf32>
    %cst_10 = arith.constant 2.500000e-01 : f32
    %19 = vector.broadcast %cst_10 : f32 to vector<8x128xf32>
    %20 = arith.addf %19, %18 : vector<8x128xf32>
    %21 = math.absf %16 : vector<8x128xf32>
    %cst_11 = arith.constant 0.000000e+00 : f32
    %22 = vector.broadcast %cst_11 : f32 to vector<8x128xf32>
    %23 = arith.subf %22, %21 : vector<8x128xf32>
    %24 = math.exp %23 : vector<8x128xf32>
    %cst_12 = arith.constant 0.000000e+00 : f32
    %25 = vector.broadcast %cst_12 : f32 to vector<8x128xf32>
    %26 = arith.maximumf %16, %25 : vector<8x128xf32>
    %cst_13 = arith.constant 1.000000e+00 : f32
    %27 = vector.broadcast %cst_13 : f32 to vector<8x128xf32>
    %28 = arith.addf %27, %24 : vector<8x128xf32>
    %29 = math.log %28 : vector<8x128xf32>
    %30 = arith.addf %26, %29 : vector<8x128xf32>
    %cst_14 = arith.constant 0.000000e+00 : f32
    %31 = vector.broadcast %cst_14 : f32 to vector<8x128xf32>
    %32 = arith.cmpf oge, %16, %31 : vector<8x128xf32>
    %cst_15 = arith.constant 1.000000e+00 : f32
    %33 = vector.broadcast %cst_15 : f32 to vector<8x128xf32>
    %34 = arith.select %32, %33, %24 : vector<8x128xi1>, vector<8x128xf32>
    %cst_16 = arith.constant 1.000000e+00 : f32
    %35 = vector.broadcast %cst_16 : f32 to vector<8x128xf32>
    %36 = arith.addf %35, %24 : vector<8x128xf32>
    %37 = arith.divf %34, %36 : vector<8x128xf32>
    %38 = arith.mulf %37, %37 : vector<8x128xf32>
    %c0_17 = arith.constant 0 : index
    %c0_18 = arith.constant 0 : index
    %39 = vector.load %arg6[%c0_17, %c0_18] : memref<8x128xf32, #tpu.memory_space<vmem>>, vector<8x128xf32>
    %40 = arith.mulf %20, %38 : vector<8x128xf32>
    %41 = arith.mulf %40, %30 : vector<8x128xf32>
    %42 = arith.addf %39, %41 : vector<8x128xf32>
    %c0_19 = arith.constant 0 : index
    %c0_20 = arith.constant 0 : index
    %43 = vector.load %arg6[%c0_19, %c0_20] : memref<8x128xf32, #tpu.memory_space<vmem>>, vector<8x128xf32>
    tpu.vector_store %arg6[%c0_19, %c0_20], %42 {strides = array<i32>} : memref<8x128xf32, #tpu.memory_space<vmem>>, vector<8x128xf32>,
    %c0_21 = arith.constant 0 : index
    %c0_22 = arith.constant 0 : index
    %44 = vector.load %arg7[%c0_21, %c0_22] : memref<8x128xf32, #tpu.memory_space<vmem>>, vector<8x128xf32>
    %45 = arith.addf %44, %20 : vector<8x128xf32>
    %c0_23 = arith.constant 0 : index
    %c0_24 = arith.constant 0 : index
    %46 = vector.load %arg7[%c0_23, %c0_24] : memref<8x128xf32, #tpu.memory_space<vmem>>, vector<8x128xf32>
    tpu.vector_store %arg7[%c0_23, %c0_24], %45 {strides = array<i32>} : memref<8x128xf32, #tpu.memory_space<vmem>>, vector<8x128xf32>,
    %c0_i32_25 = arith.constant 0 : i32
    %47 = arith.cmpi eq, %arg1, %c0_i32_25 : i32
    %48 = arith.extui %47 : i1 to i32
    %c0_i32_26 = arith.constant 0 : i32
    %49 = arith.cmpi ne, %48, %c0_i32_26 : i32
    scf.if %49 {
      %c0_27 = arith.constant 0 : index
      %c0_28 = arith.constant 0 : index
      %50 = vector.load %arg6[%c0_27, %c0_28] : memref<8x128xf32, #tpu.memory_space<vmem>>, vector<8x128xf32>
      %51 = vector.shape_cast %50 : vector<8x128xf32> to vector<1x8x128xf32>
      %cst_29 = arith.constant dense<0.000000e+00> : vector<1xf32>
      %52 = vector.multi_reduction <add>, %51, %cst_29 [1, 2] : vector<1x8x128xf32> to vector<1xf32>
      %53 = vector.shape_cast %52 : vector<1xf32> to vector<1x1x1xf32>
      %54 = vector.extract %53[0, 0, 0] : f32 from vector<1x1x1xf32>
      %55 = vector.broadcast %54 : f32 to vector<1x1x1xf32>
      %c0_30 = arith.constant 0 : index
      %c0_31 = arith.constant 0 : index
      %c0_32 = arith.constant 0 : index
      %56 = vector.load %arg4[%c0_30, %c0_31, %c0_32] : memref<1x1x1xf32, #tpu.memory_space<vmem>>, vector<1x1x1xf32>
      tpu.vector_store %arg4[%c0_30, %c0_31, %c0_32], %55 {strides = array<i32>} : memref<1x1x1xf32, #tpu.memory_space<vmem>>, vector<1x1x1xf32>,
      %c0_33 = arith.constant 0 : index
      %c0_34 = arith.constant 0 : index
      %57 = vector.load %arg7[%c0_33, %c0_34] : memref<8x128xf32, #tpu.memory_space<vmem>>, vector<8x128xf32>
      %58 = vector.shape_cast %57 : vector<8x128xf32> to vector<1x8x128xf32>
      %cst_35 = arith.constant dense<0.000000e+00> : vector<1xf32>
      %59 = vector.multi_reduction <add>, %58, %cst_35 [1, 2] : vector<1x8x128xf32> to vector<1xf32>
      %60 = vector.shape_cast %59 : vector<1xf32> to vector<1x1x1xf32>
      %61 = vector.extract %60[0, 0, 0] : f32 from vector<1x1x1xf32>
      %62 = vector.broadcast %61 : f32 to vector<1x1x1xf32>
      %c0_36 = arith.constant 0 : index
      %c0_37 = arith.constant 0 : index
      %c0_38 = arith.constant 0 : index
      %63 = vector.load %arg5[%c0_36, %c0_37, %c0_38] : memref<1x1x1xf32, #tpu.memory_space<vmem>>, vector<1x1x1xf32>
      tpu.vector_store %arg5[%c0_36, %c0_37, %c0_38], %62 {strides = array<i32>} : memref<1x1x1xf32, #tpu.memory_space<vmem>>, vector<1x1x1xf32>,
    } else {
    }
    return
  }
  func.func @transform_0(%arg0: i32, %arg1: i32) -> (i32, i32, i32) {
    %c0_i32 = arith.constant 0 : i32
    %c0_i32_0 = arith.constant 0 : i32
    return %arg0, %arg1, %c0_i32 : i32, i32, i32
  }
  func.func @transform_1(%arg0: i32, %arg1: i32) -> (i32, i32, i32) {
    %c0_i32 = arith.constant 0 : i32
    %c0_i32_0 = arith.constant 0 : i32
    return %arg0, %arg1, %c0_i32 : i32, i32, i32
  }
  func.func @transform_2(%arg0: i32, %arg1: i32) -> (i32, i32, i32) {
    %c0_i32 = arith.constant 0 : i32
    %c0_i32_0 = arith.constant 0 : i32
    %c0_i32_1 = arith.constant 0 : i32
    return %arg0, %c0_i32, %c0_i32_0 : i32, i32, i32
  }
  func.func @transform_3(%arg0: i32, %arg1: i32) -> (i32, i32, i32) {
    %c0_i32 = arith.constant 0 : i32
    %c0_i32_0 = arith.constant 0 : i32
    %c0_i32_1 = arith.constant 0 : i32
    return %arg0, %c0_i32, %c0_i32_0 : i32, i32, i32
  }
}

</mosaic_0001>

<bundles_post_ra>
// kernel: tpu_custom_call.1
= control target key start
LH: loop header
LB: loop body
LE: loop exit
PB: predicated region body
PF: predicated region fallthrough
CT: control target
= control target key end

     0   :  { %9 = vsyncpa [#allocation5], 0  ;;  %s833_s0 = inlined_call_operand.hbm [shape: f32[4,8,128], index: 0, kind: input, shape index: {}]   ;;  %s834_s1 = inlined_call_operand.hbm [shape: s8[2,8,128], index: 1, kind: input, shape index: {}]   ;;  %s835_s2 = inlined_call_operand.vmem [shape: f32[2,1,1], index: 2, kind: output, shape index: {0}]   ;;  %s836_s3 = inlined_call_operand.vmem [shape: f32[2,1,1], index: 3, kind: output, shape index: {1}]  }
   0x1   :  { %11 = vsyncpa [#allocation5 + $0x1], 0 }
   0x2   :  { %12 = vsyncpa [#allocation7], 0 }
   0x3   :  { %14 = vsyncpa [#allocation7 + $0x1], 0  ;;  %s666_s12 = smov 0   ;;  %s668_s13 = smov 0  }
   0x4   :  { %s670_s14 = smov 0   ;;  %s672_s15 = smov 0  }
   0x5   :  { %s674_s16 = smov 0   ;;  %s676_s17 = smov 0  }
   0x6 LB: > { %s438_s18 = sadd.s32 4294967295, %s640_s17   ;;  %s32_s19 = sadd.s32 1, %s636_s16  ;;  %s640_s17 = sphi %s676_s17, %s20_s17   ;;  %s636_s16 = sphi %s674_s16, %s848_s16   ;;  %s632_s15 = sphi %s672_s15, %s847_s15   ;;  %s628_s14 = sphi %s670_s14, %s846_s14   ;;  %s624_s13 = sphi %s668_s13, %s845_s13   ;;  %s620_s12 = sphi %s666_s12, %s844_s12  }
   0x7   : > { %p34_p0 = scmp.ge.s32.totalorder %s32_s19, 2  ;;  %s41_s20 = sadd.s32 1, %s628_s14 }
   0x8   : > { %p48_p1 = scmp.ne.s32.totalorder %s628_s14, %s624_s13  ;;  %p49_p2 = scmp.eq.s32.totalorder %s640_s17, 0 }
   0x9   : > { %s850_s19 = smov (%p34_p0, %s32_s19), 0  ;;  %p54_p4 = scmp.ne.s32.totalorder %s624_s13, %s620_s12 }
   0xa   : > { %p702_p3 = por %p49_p2, %p48_p1  ;;  %s36_s22 = ssub.s32 %s636_s16, %s850_s19 }
   0xb   : > { %p55_p5 = scmp.eq.s32.totalorder %s438_s18, 0  ;;  %p39_p6 = scmp.eq.s32.totalorder %s36_s22, 0 }
   0xc   : > { %p469_p8 = scmp.lt.s32.totalorder %s640_s17, 2  ;;  %s718_s25 = sand.u32 1, %s628_s14  }
   0xd   : > { %p709_p7 = por %p55_p5, %p54_p4  ;;  %s453_s26 = sshll.u32 %s636_s16, 8 }
   0xe   : > { %s715_s24 = scalar_select %p39_p6, %s628_s14, %s41_s20  }
   0xf   : > { %s839_s23 = scalar_select %p709_p7, 1, 0 }
  0x10   : > { %s442_s27 = sshll.u32 %s718_s25, 4  ;;  %s725_s30 = scalar_lea.hbm %s833_s0, %s453_s26 }
  0x11   : > { %s162_s4 = scalar_lea.vmem [#allocation4], %s442_s27  ;;  %p729_p9 = pnand %p469_p8, %p702_p3 }
  0x12   : > { %s170_s5 = sshll.u32 %s162_s4, 4  ;;  %s159_s7 = scalar_lea.sflag [#allocation5], %s718_s25  ;;  %s733_s5 = int_to_ptr.vmem [resolvable:$true] %s170_s5 }
  0x13   : > { %s526_s8 = scalar_lea.hbm %s725_s30, 256  ;;  %p528_p11 = pneg %p729_p9 }
  0x14   : > { %p527_p10 = scmp.ne.s32.totalorder %s725_s30, %s526_s8  ;;  %s531_s11 = scalar_lea.hbm %s833_s0, 512 }
  0x15   : > { %p532_p0 = scmp.lt.u32.totalorder %s725_s30, %s833_s0  ;;  %p533_p1 = scmp.lt.u32.totalorder %s531_s11, %s526_s8 }
  0x16   : > { %p529_p12 = pnand %p528_p11, %p527_p10  ;;  %p535_p3 = scmp.lt.u32.totalorder %s526_s8, %s725_s30 }
  0x17   : > { %p534_p2 = por %p533_p1, %p532_p0 }
  0x18   : > { %p530_p13 = pneg %p529_p12 }
  0x19   : > { %p536_p4 = por %p535_p3, %p534_p2 }
  0x1b   : > { %p537_p5 = pnand %p536_p4, %p530_p13 }
  0x1d   : > { %540 = shalt.err (!%p537_p5)
}
  0x1e   : > { %s541_s20 = scalar_lea.vmem %s733_s5, 256  ;;  %s642_s21 = smov [#allocation4]  }
  0x1f   : > { %p542_p6 = scmp.ne.s32.totalorder %s733_s5, %s541_s20  ;;  %s546_s22 = sshll.u32 %s642_s21, 4  ;;  %s547_s22 = int_to_ptr.vmem [resolvable:$false] %s546_s22 }
  0x20   : > { %s548_s26 = scalar_lea.vmem %s547_s22, 512  ;;  %p549_p12 = scmp.lt.s32.totalorder %s733_s5, %s547_s22 }
  0x21   : > { %p544_p8 = pnand %p542_p6, %p528_p11  ;;  %p550_p0 = scmp.lt.s32.totalorder %s548_s26, %s541_s20 }
  0x23   : > { %p545_p10 = pneg %p544_p8  ;;  %p551_p1 = por %p550_p0, %p549_p12 }
  0x25   : > { %p552_p2 = pnand %p551_p1, %p545_p10 }
  0x27   : > { %555 = shalt.err (!%p552_p2)
}
  0x28   : > { %s643_s27 = smov 128   ;;  %s644_s28 = smov 8  }
  0x29   : > { %465 = dma.hbm_to_vmem [thread:$0]  (!%p729_p9), %s725_s30, 256, %s733_s5, %s159_s7, %s643_s27, %s643_s27, %s644_s28  }
  0x2a   : > { %p447_p13 = scmp.ge.s32.totalorder %s640_s17, 1  ;;  %p197_p3 = scmp.lt.s32.totalorder %s640_s17, 3 }
  0x2b   : > { %s445_s29 = sshll.u32 %s718_s25, 1  ;;  %s446_s8 = sshll.u32 %s636_s16, 5 }
  0x2c   : > { %p766_p4 = pnand %p447_p13, %p197_p3  ;;  %s184_s9 = scalar_lea.vmem [#allocation6], %s445_s29 }
  0x2d   : > { %s192_s10 = sshll.u32 %s184_s9, 4  ;;  %s774_s18 = scalar_lea.hbm %s834_s1, %s446_s8  ;;  %s193_s10 = int_to_ptr.vmem [resolvable:$true] %s192_s10 }
  0x2e   : > { %s841_s4 = scalar_select %p766_p4, 1, 0 }
  0x2f   : > { %s181_s30 = scalar_lea.sflag [#allocation7], %s718_s25  ;;  %s556_s5 = scalar_lea.hbm %s774_s18, 32 }
  0x30   : > { %p557_p5 = scmp.ne.s32.totalorder %s774_s18, %s556_s5  ;;  %s561_s21 = scalar_lea.hbm %s834_s1, 64 }
  0x31   : > { %p562_p10 = scmp.lt.u32.totalorder %s774_s18, %s834_s1  ;;  %p563_p12 = scmp.lt.u32.totalorder %s561_s21, %s556_s5 }
  0x32   : > { %p559_p6 = pnand %p557_p5, %p528_p11  ;;  %p565_p1 = scmp.lt.u32.totalorder %s556_s5, %s774_s18 }
  0x33   : > { %p564_p0 = por %p563_p12, %p562_p10 }
  0x34   : > { %p560_p8 = pneg %p559_p6 }
  0x35   : > { %p566_p2 = por %p565_p1, %p564_p0 }
  0x37   : > { %p567_p13 = pnand %p566_p2, %p560_p8 }
  0x39   : > { %570 = shalt.err (!%p567_p13)
}
  0x3a   : > { %s571_s25 = scalar_lea.vmem %s193_s10, 32  ;;  %s645_s27 = smov [#allocation6]  }
  0x3b   : > { %p572_p3 = scmp.ne.s32.totalorder %s193_s10, %s571_s25  ;;  %s576_s28 = sshll.u32 %s645_s27, 4  ;;  %s577_s28 = int_to_ptr.vmem [resolvable:$false] %s576_s28 }
  0x3c   : > { %s578_s29 = scalar_lea.vmem %s577_s28, 64  ;;  %p579_p7 = scmp.lt.s32.totalorder %s193_s10, %s577_s28 }
  0x3d   : > { %p574_p5 = pnand %p572_p3, %p528_p11  ;;  %p580_p4 = scmp.lt.s32.totalorder %s578_s29, %s571_s25 }
  0x3f   : > { %p575_p6 = pneg %p574_p5  ;;  %p581_p10 = por %p580_p4, %p579_p7 }
  0x41   : > { %p582_p12 = pnand %p581_p10, %p575_p6 }
  0x43   : > { %585 = shalt.err (!%p582_p12)
}
  0x44   : > { %468 = dma.hbm_to_vmem [thread:$0]  (!%p729_p9), %s774_s18, 32, %s193_s10, %s181_s30  }
  0x45   : > { %p842_p8 = scmp.ne.s32.totalorder %s841_s4, 0 }
  0x46   : > { %s203_s8 = sand.u32 (!%p842_p8), 1, %s624_s13   ;;  %p843_p11 = scmp.ne.s32.totalorder (!%p842_p8), %s839_s23, 0 }
  0x47   : > { %201 = sbr.rel (%p842_p8) target bundleno = 342 (0x156), region = 28  ;;  %s448_s9 = sshll.u32 (!%p842_p8), %s203_s8, 4 }
  0x48   : > { %s204_s11 = scalar_lea.sflag (!%p842_p8), [#allocation5], %s203_s8  ;;  %s207_s12 = scalar_lea.vmem (!%p842_p8), [#allocation4], %s448_s9 }
  0x4e   : > { %611 = dma.done.wait (%p843_p11), %s204_s11, 256  }
  0x4f   : > { %613 = vsyncadd (%p843_p11), %s204_s11, 4294967040  ;;  %s449_s5 = sshll.u32 %s203_s8, 1  ;;  %s213_s7 = scalar_lea.sflag [#allocation7], %s203_s8 }
  0x50   : > { %s216_s6 = scalar_lea.vmem [#allocation6], %s449_s5 }
  0x51   : > { %615 = dma.done.wait (%p843_p11), %s213_s7, 32  }
  0x52   : > { %617 = vsyncadd (%p843_p11), %s213_s7, 4294967264  ;;  %v261_v0 = vld [vmem:[%s216_s6] sm:$0x3]  ;;  %v450_v3 = vld [vmem:[%s207_s12 + $0x8] sm:$0xff]  ;;  %p246_p7 = scmp.lt.s32.totalorder %s632_s15, 1  ;;  %vm306_vm1 = vcmask 0  }
  0x53   : > { %v262_v1 = vunpack.c.0.s8 %v261_v0  ;;  %v258_v2 = vld [vmem:[%s207_s12] sm:$0xff] }
  0x54   : > { %v264_v5 = vsub.f32 %v450_v3, %v258_v2  ;;  %s852_s15 = smov (!%p246_p7, %s632_s15), 1 }
  0x55   : > { %v263_v4 = vcvt.s32.f32 %v262_v1  ;;  %s248_s10 = scalar_lea.vmem %s835_s2, %s852_s15  ;;  %s251_s21 = scalar_lea.vmem %s836_s3, %s852_s15 }
  0x57   : > { %v265_v6 = vmul.f32 2.0, %v263_v4  ;;  %v268_v14 = vmul.f32 0.5, %v263_v4 }
  0x59   : > { %v266_v7 = vsub.f32 1.0, %v265_v6  ;;  %v269_v20 = vadd.f32 0.25, %v268_v14 }
  0x5b   : > { %v267_v8 = vmul.f32 %v266_v7, %v264_v5 }
  0x5d   : > { %v270_v9 = vand.u32 2147483647, %v267_v8  ;;  %vm279_vm0 = vcmp.ge.f32.partialorder %v267_v8, 0.0  ;;  %v274_v17 = vmax.f32 %v267_v8, 0.0 }
  0x5f   : > { %v271_v10 = vsub.f32 0.0, %v270_v9 }
  0x61   : > { %v272_v11 = vmul.f32 1.442695, %v271_v10 }
  0x63   : > { %520 = vpow2.f32 %v272_v11 }
  0x6d   : > { %v521_v12 = vpop.eup %520 }
  0x6e   : > { %v275_v13 = vadd.f32 1.0, %v521_v12  ;;  %v280_v15 = vsel %vm279_vm0, 1.0, %v521_v12 }
  0x70   : > { %522 = vlog2.f32 %v275_v13 }
  0x71   : > { %524 = vrcp.f32 %v275_v13 }
  0x7a   : > { %v523_v16 = vpop.eup %522 }
  0x7b   : > { %v525_v18 = vpop.eup %524  ;;  %v277_v19 = vmul.f32 0.6931472, %v523_v16 }
  0x7c   : > { %v282_v21 = vmul.f32 %v525_v18, %v280_v15 }
  0x7d   : > { %v278_v22 = vadd.f32 %v277_v19, %v274_v17 }
  0x7e   : > { %v283_v23 = vmul.f32 %v282_v21, %v282_v21 }
  0x80   : > { %v285_v24 = vmul.f32 %v283_v23, %v269_v20 }
  0x82   : > { %v286_v25 = vmul.f32 %v285_v24, %v278_v22 }
  0x84   : > { %296 = vadd.xlane.f32.xlu0 %v286_v25 }
  0x88   : > { %309 = vadd.xlane.f32.xlu0 %v269_v20 }
 0x111   : > { %v297_v26 = vpop.xlane.xlu0 %296 }
 0x112   : > { %v298_v27 = vrot.slane %v297_v26, 4 }
 0x114   : > { %v299_v28 = vadd.f32 %v298_v27, %v297_v26 }
 0x115   : > { %v310_v29 = vpop.xlane.xlu0 %309 }
 0x116   : > { %v300_v30 = vrot.slane %v299_v28, 2  ;;  %v311_v31 = vrot.slane %v310_v29, 4 }
 0x118   : > { %v312_v32 = vadd.f32 %v311_v31, %v310_v29  ;;  %v301_v33 = vadd.f32 %v300_v30, %v299_v28 }
 0x11a   : > { %v313_v34 = vrot.slane %v312_v32, 2  ;;  %v302_v35 = vrot.slane %v301_v33, 1 }
 0x11c   : > { %v314_v36 = vadd.f32 %v313_v34, %v312_v32  ;;  %v303_v37 = vadd.f32 %v302_v35, %v301_v33 }
 0x11e   : > { %454 = vpush %v303_v37  ;;  %v315_v38 = vrot.slane %v314_v36, 1 }
 0x120   : > { %v316_v39 = vadd.f32 %v315_v38, %v314_v36 }
 0x122   : > { %456 = vpush %v316_v39 }
 0x14f   : > { %s455_s18 = spop %454 }
 0x150   : > { %v305_v40 = vstv %s455_s18 }
 0x151   : > { %307 = vst.msk [vmem:[%s248_s10] sm:$0x1] %vm306_vm1, %v305_v40 }
 0x153   : > { %s457_s22 = spop %456 }
 0x154   : > { %v318_v41 = vstv %s457_s22 }
 0x155   : > { %319 = vst.msk [vmem:[%s251_s21] sm:$0x1] %vm306_vm1, %v318_v41 }
 0x156 PF: > { %s20_s17 = sadd.s32 1, %s640_s17   ;;  %s844_s12 = smov %s624_s13 }
 0x157   : > { %p17_p9 = scmp.ge.s32.totalorder %s20_s17, 4   ;;  %s845_s13 = smov %s628_s14 }
 0x158   : > { %s846_s14 = smov %s715_s24  ;;  %s847_s15 = smov %s636_s16 }
 0x159   : > { %s848_s16 = smov %s850_s19  ;;  %19 = sbr.rel (!%p17_p9) target bundleno = 6 (0x6), region = 102 }
 0x160   :  { %349 = vsyncpa [#allocation5], 1 }
 0x161   :  { %351 = vsyncpa [#allocation5 + $0x1], 1 }
 0x162   :  { %352 = vsyncpa [#allocation7], 1 }
 0x163   :  { %354 = vsyncpa [#allocation7 + $0x1], 1 }

</bundles_post_ra>
